<compile_context>
chip_gen: v7x
topology: tpu7x:2x2x1
jax: 0.10.0
libtpu: 0.0.40
codegen_flags: <defaults>
</compile_context>

<pallas_src>
import functools
import math

import jax
import jax.numpy as jnp
from jax import lax
from jax.experimental import pallas as pl
from jax.experimental.pallas import tpu as pltpu


def _round_up(n, m):
    return ((n + m - 1) // m) * m


# --------------------------- hardware-aware tiling ---------------------------

def _hardware_profile():
    """Returns (physical VMEM bytes, target row tile, multiple TCs per device)."""
    kind = ""
    try:
        kind = jax.devices()[0].device_kind.lower()
    except Exception:
        pass
    vmem = None
    try:
        vmem = int(pltpu.get_tpu_info().vmem_capacity_bytes)
    except Exception:
        vmem = None
    if vmem is None or vmem <= 0:
        if "v7" in kind:
            vmem = 64 << 20
        elif any(g in kind for g in ("v4", "v5", "v6")):
            vmem = 128 << 20
        else:
            vmem = 64 << 20                      # conservative default
    if "v7" in kind:
        vmem = min(vmem, 64 << 20)               # per-TC VMEM on v7x
    if "v6" in kind:
        tm_target = 512      # MXU/HBM ratio ~650 flop/B needs big row tiles
    elif "v7" in kind:
        tm_target = 384
    elif "v5" in kind:
        tm_target = 256      # already MXU-bound at modest tm
    else:
        tm_target = 256
    multi_tc = "v7" in kind  # 2 TensorCores share the "parallel" grid axis
    return vmem, tm_target, multi_tc


def _vmem_footprint(tm, tf, d, x_bytes, w_bytes, use_hnorm, weight_buffers):
    """Conservative (everything double-buffered) VMEM footprint estimate."""
    fp = 2 * tm * d * x_bytes                    # x tile
    fp += weight_buffers * d * tf * w_bytes      # W1 column tile
    fp += weight_buffers * tf * d * w_bytes      # W2 row tile
    fp += 2 * tf * 4 + 3 * 2 * d * 4             # b1, b2, gamma, beta
    fp += 2 * tm * d * x_bytes                   # output tile
    fp += tm * d * 4                             # f32 accumulator scratch
    if use_hnorm:
        fp += tm * d * w_bytes                   # cached LN(x) scratch
    return fp


def _pick_row_tile(rows, tm_target, prefer_two_tiles):
    tm_target = max(8, int(tm_target))
    if rows <= 8:
        return rows                              # full-extent block (legal)
    cap = min(tm_target, _round_up(rows, 8))
    if prefer_two_tiles and rows <= cap:
        cap = min(cap, max(8, _round_up((rows + 1) // 2, 8)))
    cap8 = max(8, (cap // 8) * 8)
    t = cap8
    while t >= max(8, cap8 // 2):                # prefer a divisor near target
        if rows % t == 0:
            return t
        t -= 8
    if rows <= cap:
        return rows                              # one full-extent tile
    return cap8                                  # ragged last tile (masked)


def _pick_f_tile(f_dim, d, tm, x_bytes, w_bytes, use_hnorm, budget, f_tile):
    if f_tile is not None:                       # explicit override
        tf = min(int(f_tile), f_dim)
        if tf < f_dim:
            tf = max(128, (tf // 128) * 128)
        return tf
    # Prefer fully VMEM-resident weights: constant index maps -> DMA'd once.
    if _vmem_footprint(tm, f_dim, d, x_bytes, w_bytes, use_hnorm, 2) <= budget:
        return f_dim
    min_tf = 512 if w_bytes <= 2 else 256        # keep W1 DMA chunks >= 1 KiB
    start = max(128, (min(f_dim, 2048) // 128) * 128)
    best_any = best_div = None
    tf = start
    while tf >= 128:
        if _vmem_footprint(tm, tf, d, x_bytes, w_bytes, use_hnorm, 2) <= budget:
            if best_any is None:
                best_any = tf
            if f_dim % tf == 0:
                best_div = tf
                break
        tf -= 128
    if best_div is not None and best_div >= min_tf:
        return best_div
    if best_any is not None and best_any >= min_tf:
        return best_any                          # F gets zero-padded
    if best_div is not None:
        return best_div
    if best_any is not None:
        return best_any
    return 128                                   # last resort


# --------------------------------- kernel ------------------------------------

def _gelu(x, approximate):
    if approximate:
        c = jnp.float32(math.sqrt(2.0 / math.pi))
        return 0.5 * x * (1.0 + jnp.tanh(c * (x + 0.044715 * x * x * x)))
    # PyTorch nn.GELU() default: exact erf form.
    return 0.5 * x * (1.0 + lax.erf(x * jnp.float32(1.0 / math.sqrt(2.0))))


def _layer_norm(x, gamma, beta, eps):
    mean = jnp.mean(x, axis=-1, keepdims=True)
    var = jnp.mean(jnp.square(x - mean), axis=-1, keepdims=True)
    inv_std = lax.rsqrt(var + jnp.float32(eps))   # EUP rsqrt, no divide
    return (x - mean) * inv_std * gamma + beta


def _ffn_kernel(x_ref, w1_ref, b1_ref, w2_ref, b2_ref, gamma_ref, beta_ref,
                o_ref, acc_ref, *scratch, eps, layer_norm_first,
                approximate_gelu, use_hnorm):
    f = pl.program_id(1)
    nf = pl.num_programs(1)

    # --- init (once per row tile): zero accumulator; cache LN(x) / cast(x).
    @pl.when(f == 0)
    def _init():
        acc_ref[...] = jnp.zeros_like(acc_ref)
        if use_hnorm:
            x = x_ref[...].astype(jnp.float32)
            if layer_norm_first:
                h = _layer_norm(x, gamma_ref[...].astype(jnp.float32),
                                beta_ref[...].astype(jnp.float32), eps)
            else:
                h = x
            scratch[0][...] = h.astype(scratch[0].dtype)

    # --- per F-tile: (TM, D) @ (D, TF) -> GELU -> (TM, TF) @ (TF, D) accum.
    h = scratch[0][...] if use_hnorm else x_ref[...]
    h1 = jnp.dot(h, w1_ref[...], preferred_element_type=jnp.float32)
    h1 = h1 + b1_ref[...].astype(jnp.float32)
    g = _gelu(h1, approximate_gelu)
    acc_ref[...] += jnp.dot(g.astype(w2_ref.dtype), w2_ref[...],
                            preferred_element_type=jnp.float32)

    # --- finalize: bias + residual (+ post-norm), write output tile.
    @pl.when(f == nf - 1)
    def _finalize():
        out = (acc_ref[...] + b2_ref[...].astype(jnp.float32)
               + x_ref[...].astype(jnp.float32))
        if not layer_norm_first:
            out = _layer_norm(out, gamma_ref[...].astype(jnp.float32),
                              beta_ref[...].astype(jnp.float32), eps)
        o_ref[...] = out.astype(o_ref.dtype)


# --------------------------------- wrapper -----------------------------------

def feed_forward(x, w1, b1, w2, b2, gamma, beta, *,
                 eps=1e-6, layer_norm_first=True,
                 row_tile=None, f_tile=None,
                 matmul_dtype=None, approximate_gelu=None,
                 weight_buffers=2, max_vmem_bytes=None):
    """x: [B, S, D]; w1: [D, F]; b1: [F]; w2: [F, D]; b2: [D]; gamma/beta: [D]."""
    B, S, D = x.shape
    F = w1.shape[1]
    rows = B * S

    if matmul_dtype is None:
        matmul_dtype = x.dtype
    matmul_dtype = jnp.dtype(matmul_dtype)
    if approximate_gelu is None:
        # Small D: erf's VPU polynomial binds before the MXU; tanh uses the EUP.
        approximate_gelu = D <= 1024

    x_bytes = jnp.dtype(x.dtype).itemsize
    w_bytes = matmul_dtype.itemsize
    use_hnorm = layer_norm_first or (matmul_dtype != jnp.dtype(x.dtype))

    phys_vmem, tm_target, multi_tc = _hardware_profile()
    if row_tile is not None:
        tm_target = row_tile
    budget_base = max_vmem_bytes if max_vmem_bytes is not None else phys_vmem
    budget = int(budget_base * 0.80)

    tm = _pick_row_tile(rows, tm_target, multi_tc)
    tf = _pick_f_tile(F, D, tm, x_bytes, w_bytes, use_hnorm, budget, f_tile)

    if tf >= F:
        tf, F_pad, nf = F, F, 1                      # weights VMEM-resident
    else:
        F_pad = _round_up(F, tf)
        nf = F_pad // tf

    # Optional deeper weight pipelining (only when streaming and it fits).
    use_buffered = (nf > 1 and weight_buffers > 2 and
                    _vmem_footprint(tm, tf, D, x_bytes, w_bytes, use_hnorm,
                                    weight_buffers) <= budget)
    wbuf = weight_buffers if use_buffered else 2

    grid_rows = pl.cdiv(rows, tm)                    # ragged last tile masked

    x2 = x.reshape(rows, D)                          # free reshape; no pad
    w1c = w1.astype(matmul_dtype)
    w2c = w2.astype(matmul_dtype)
    b1c = b1.astype(jnp.float32)
    if F_pad != F:
        # Zero-padding F is exact: gelu(0) = 0 and the padded W2 rows are 0.
        w1c = jnp.pad(w1c, ((0, 0), (0, F_pad - F)))
        b1c = jnp.pad(b1c, (0, F_pad - F))
        w2c = jnp.pad(w2c, ((0, F_pad - F), (0, 0)))
    b1_2 = b1c.reshape(1, F_pad)
    b2_2 = b2.reshape(1, D).astype(jnp.float32)
    gamma2 = gamma.reshape(1, D).astype(jnp.float32)
    beta2 = beta.reshape(1, D).astype(jnp.float32)

    footprint = _vmem_footprint(tm, tf, D, x_bytes, w_bytes, use_hnorm, wbuf)
    vmem_limit = max(footprint + (8 << 20), 32 << 20)
    vmem_limit = min(vmem_limit, phys_vmem - (8 << 20))  # leave HW headroom
    vmem_limit = max(vmem_limit, 16 << 20)

    kernel = functools.partial(_ffn_kernel, eps=eps,
                               layer_norm_first=layer_norm_first,
                               approximate_gelu=approximate_gelu,
                               use_hnorm=use_hnorm)

    w_kwargs = {"pipeline_mode": pl.Buffered(wbuf)} if use_buffered else {}

    scratch_shapes = [pltpu.VMEM((tm, D), jnp.float32)]   # f32 acc for GEMM 2
    if use_hnorm:
        scratch_shapes.append(pltpu.VMEM((tm, D), matmul_dtype))

    out2 = pl.pallas_call(
        kernel,
        out_shape=jax.ShapeDtypeStruct((rows, D), x.dtype),
        grid_spec=pltpu.PrefetchScalarGridSpec(
            num_scalar_prefetch=0,
            grid=(grid_rows, nf),
            in_specs=[
                pl.BlockSpec((tm, D), lambda i, f: (i, 0)),              # x
                pl.BlockSpec((D, tf), lambda i, f: (0, f), **w_kwargs),  # W1
                pl.BlockSpec((1, tf), lambda i, f: (0, f)),              # b1
                pl.BlockSpec((tf, D), lambda i, f: (f, 0), **w_kwargs),  # W2
                pl.BlockSpec((1, D), lambda i, f: (0, 0)),               # b2
                pl.BlockSpec((1, D), lambda i, f: (0, 0)),               # gamma
                pl.BlockSpec((1, D), lambda i, f: (0, 0)),               # beta
            ],
            out_specs=pl.BlockSpec((tm, D), lambda i, f: (i, 0)),
            scratch_shapes=scratch_shapes),
        compiler_params=pltpu.CompilerParams(
            dimension_semantics=("parallel", "arbitrary"),
            vmem_limit_bytes=int(vmem_limit)),
    )(x2, w1c, b1_2, w2c, b2_2, gamma2, beta2)

    return out2.reshape(B, S, D)


# ----------------------------- reference & demo ------------------------------

def _xavier_uniform(key, shape, gain=1.0):
    # shape is torch Linear weight convention: (fan_out, fan_in)
    fan_out, fan_in = shape
    limit = gain * math.sqrt(6.0 / (fan_in + fan_out))
    return jax.random.uniform(key, shape, jnp.float32, -limit, limit)


def _reference(x, w1, b1, w2, b2, gamma, beta, eps, layer_norm_first,
               approximate_gelu):
    def ln(t):
        mean = jnp.mean(t, axis=-1, keepdims=True)
        var = jnp.mean((t - mean) ** 2, axis=-1, keepdims=True)
        return (t - mean) / jnp.sqrt(var + eps) * gamma + beta

    def gelu(h):
        if approximate_gelu:
            c = math.sqrt(2.0 / math.pi)
            return 0.5 * h * (1.0 + jnp.tanh(c * (h + 0.044715 * h ** 3)))
        return 0.5 * h * (1.0 + lax.erf(h / math.sqrt(2.0)))

    def ff(t):
        return gelu(t @ w1 + b1) @ w2 + b2

    if layer_norm_first:
        return ff(ln(x)) + x
    return ln(ff(x) + x)


if __name__ == "__main__":
    EPS = 1e-6
    key = jax.random.PRNGKey(0)

    def make_params(k, d_embed, d_ff):
        kw1, kw2 = jax.random.split(k)
        # Mirrors init_weights: W1 xavier_uniform(gain=sqrt(2)), W2 xavier_uniform,
        # zero biases, gamma=1, beta=0.  Stored transposed for right-multiplication.
        w1_t = _xavier_uniform(kw1, (d_ff, d_embed), gain=math.sqrt(2.0))
        w2_t = _xavier_uniform(kw2, (d_embed, d_ff), gain=1.0)
        return (w1_t.T, jnp.zeros((d_ff,), jnp.float32),
                w2_t.T, jnp.zeros((d_embed,), jnp.float32),
                jnp.ones((d_embed,), jnp.float32),
                jnp.zeros((d_embed,), jnp.float32))

    # --- case 1: module-sized demo (B=2, S=8, d_embed=32, d_ff=64) ----------
    B, S, D_EMBED, D_FF = 2, 8, 32, 64
    k0, k1, k2, k3 = jax.random.split(key, 4)
    x = jax.random.normal(k0, (B, S, D_EMBED), jnp.float32)
    w1, b1, w2, b2, gamma, beta = make_params(k1, D_EMBED, D_FF)

    # pre-norm, f32, exact erf GELU (torch parity)
    out = jax.block_until_ready(feed_forward(
        x, w1, b1, w2, b2, gamma, beta, eps=EPS, layer_norm_first=True,
        approximate_gelu=False))
    ref = _reference(x, w1, b1, w2, b2, gamma, beta, EPS, True, False)
    assert out.shape == (B, S, D_EMBED)
    assert jnp.allclose(out, ref, atol=5e-5, rtol=5e-5), "pre-norm f32 mismatch"

    # post-norm, f32 (exercises the no-hnorm-scratch fast path)
    out = jax.block_until_ready(feed_forward(
        x, w1, b1, w2, b2, gamma, beta, eps=EPS, layer_norm_first=False,
        approximate_gelu=False))
    ref = _reference(x, w1, b1, w2, b2, gamma, beta, EPS, False, False)
    assert jnp.allclose(out, ref, atol=5e-5, rtol=5e-5), "post-norm f32 mismatch"

    # pre-norm, default flags (auto tanh GELU for small D)
    out = jax.block_until_ready(feed_forward(
        x, w1, b1, w2, b2, gamma, beta, eps=EPS, layer_norm_first=True))
    ref = _reference(x, w1, b1, w2, b2, gamma, beta, EPS, True, True)
    assert jnp.allclose(out, ref, atol=5e-5, rtol=5e-5), "auto-gelu mismatch"

    # pre-norm, bf16 matmul operands with f32 accumulation (loose check)
    out = jax.block_until_ready(feed_forward(
        x, w1, b1, w2, b2, gamma, beta, eps=EPS, layer_norm_first=True,
        matmul_dtype=jnp.bfloat16, approximate_gelu=False))
    ref = _reference(x, w1, b1, w2, b2, gamma, beta, EPS, True, False)
    assert jnp.allclose(out, ref, atol=5e-2, rtol=5e-2), "bf16 mismatch"

    # --- case 2: ragged row count (rows=20, tm=8 -> masked last row tile) ----
    B2, S2 = 4, 5
    x2 = jax.random.normal(k2, (B2, S2, D_EMBED), jnp.float32)
    out = jax.block_until_ready(feed_forward(
        x2, w1, b1, w2, b2, gamma, beta, eps=EPS, layer_norm_first=True,
        approximate_gelu=False, row_tile=8))
    ref = _reference(x2, w1, b1, w2, b2, gamma, beta, EPS, True, False)
    assert jnp.allclose(out, ref, atol=5e-5, rtol=5e-5), "ragged-rows mismatch"

    # --- case 3: streamed + zero-padded F (F=320, tf=128 -> nf=3) ------------
    B3, S3, D3, F3 = 2, 16, 128, 320
    x3 = jax.random.normal(k3, (B3, S3, D3), jnp.float32)
    w1b, b1b, w2b, b2b, gammab, betab = make_params(k1, D3, F3)
    out = jax.block_until_ready(feed_forward(
        x3, w1b, b1b, w2b, b2b, gammab, betab, eps=EPS, layer_norm_first=True,
        approximate_gelu=False, f_tile=128))
    ref = _reference(x3, w1b, b1b, w2b, b2b, gammab, betab, EPS, True, False)
    assert jnp.allclose(out, ref, atol=1e-4, rtol=1e-4), "streamed-F mismatch"

    print("KERNEL_OK")
</pallas_src>

<mosaic_0001>
module attributes {stable_mosaic.version = 11 : i64} {
  func.func @_ffn_kernel(%arg0: i32, %arg1: i32, %arg2: memref<16x32xf32, #tpu.memory_space<vmem>>, %arg3: memref<32x64xf32, #tpu.memory_space<vmem>>, %arg4: memref<1x64xf32, #tpu.memory_space<vmem>>, %arg5: memref<64x32xf32, #tpu.memory_space<vmem>>, %arg6: memref<1x32xf32, #tpu.memory_space<vmem>>, %arg7: memref<1x32xf32, #tpu.memory_space<vmem>>, %arg8: memref<1x32xf32, #tpu.memory_space<vmem>>, %arg9: memref<16x32xf32, #tpu.memory_space<vmem>>, %arg10: memref<16x32xf32, #tpu.memory_space<vmem>>, %arg11: memref<16x32xf32, #tpu.memory_space<vmem>>) attributes {dimension_semantics = [#tpu.dimension_semantics<parallel>, #tpu.dimension_semantics<arbitrary>], iteration_bounds = array<i64: 1, 1>, scalar_prefetch = 0 : i64, scratch_operands = 2 : i64, tpu.core_type = #tpu.core_type<tc>, window_params = [{transform_indices = @transform_0, window_bounds = array<i64: 16, 32>}, {transform_indices = @transform_1, window_bounds = array<i64: 32, 64>}, {transform_indices = @transform_2, window_bounds = array<i64: 1, 64>}, {transform_indices = @transform_3, window_bounds = array<i64: 64, 32>}, {pipeline_mode = #tpu.pipeline_mode<synchronous>, transform_indices = @transform_4, window_bounds = array<i64: 1, 32>}, {pipeline_mode = #tpu.pipeline_mode<synchronous>, transform_indices = @transform_5, window_bounds = array<i64: 1, 32>}, {pipeline_mode = #tpu.pipeline_mode<synchronous>, transform_indices = @transform_6, window_bounds = array<i64: 1, 32>}, {transform_indices = @transform_7, window_bounds = array<i64: 16, 32>}]} {
    %c0_i32 = arith.constant 0 : i32
    %0 = arith.cmpi eq, %arg1, %c0_i32 : i32
    %1 = arith.extui %0 : i1 to i32
    %c0_i32_0 = arith.constant 0 : i32
    %2 = arith.cmpi ne, %1, %c0_i32_0 : i32
    scf.if %2 {
      %cst_18 = arith.constant 0.000000e+00 : f32
      %25 = vector.broadcast %cst_18 : f32 to vector<16x32xf32>
      %c0_19 = arith.constant 0 : index
      %c0_20 = arith.constant 0 : index
      %26 = vector.load %arg10[%c0_19, %c0_20] : memref<16x32xf32, #tpu.memory_space<vmem>>, vector<16x32xf32>
      tpu.vector_store %arg10[%c0_19, %c0_20], %25 {strides = array<i32>} : memref<16x32xf32, #tpu.memory_space<vmem>>, vector<16x32xf32>,
      %c0_21 = arith.constant 0 : index
      %c0_22 = arith.constant 0 : index
      %27 = vector.load %arg2[%c0_21, %c0_22] : memref<16x32xf32, #tpu.memory_space<vmem>>, vector<16x32xf32>
      %c0_23 = arith.constant 0 : index
      %c0_24 = arith.constant 0 : index
      %28 = vector.load %arg7[%c0_23, %c0_24] : memref<1x32xf32, #tpu.memory_space<vmem>>, vector<1x32xf32>
      %c0_25 = arith.constant 0 : index
      %c0_26 = arith.constant 0 : index
      %29 = vector.load %arg8[%c0_25, %c0_26] : memref<1x32xf32, #tpu.memory_space<vmem>>, vector<1x32xf32>
      %cst_27 = arith.constant dense<0.000000e+00> : vector<16xf32>
      %30 = vector.multi_reduction <add>, %27, %cst_27 [1] : vector<16x32xf32> to vector<16xf32>
      %31 = vector.shape_cast %30 : vector<16xf32> to vector<16x1xf32>
      %cst_28 = arith.constant 3.200000e+01 : f32
      %32 = vector.broadcast %cst_28 : f32 to vector<16x1xf32>
      %33 = arith.divf %31, %32 : vector<16x1xf32>
      %34 = vector.broadcast %33 : vector<16x1xf32> to vector<16x32xf32>
      %35 = arith.subf %27, %34 : vector<16x32xf32>
      %36 = arith.mulf %35, %35 : vector<16x32xf32>
      %cst_29 = arith.constant dense<0.000000e+00> : vector<16xf32>
      %37 = vector.multi_reduction <add>, %36, %cst_29 [1] : vector<16x32xf32> to vector<16xf32>
      %38 = vector.shape_cast %37 : vector<16xf32> to vector<16x1xf32>
      %cst_30 = arith.constant 3.200000e+01 : f32
      %39 = vector.broadcast %cst_30 : f32 to vector<16x1xf32>
      %40 = arith.divf %38, %39 : vector<16x1xf32>
      %cst_31 = arith.constant 9.99999997E-7 : f32
      %41 = vector.broadcast %cst_31 : f32 to vector<16x1xf32>
      %42 = arith.addf %40, %41 : vector<16x1xf32>
      %43 = math.rsqrt %42 : vector<16x1xf32>
      %44 = vector.broadcast %33 : vector<16x1xf32> to vector<16x32xf32>
      %45 = arith.subf %27, %44 : vector<16x32xf32>
      %46 = vector.broadcast %43 : vector<16x1xf32> to vector<16x32xf32>
      %47 = arith.mulf %45, %46 : vector<16x32xf32>
      %48 = vector.broadcast %28 : vector<1x32xf32> to vector<16x32xf32>
      %49 = arith.mulf %47, %48 : vector<16x32xf32>
      %50 = vector.broadcast %29 : vector<1x32xf32> to vector<16x32xf32>
      %51 = arith.addf %49, %50 : vector<16x32xf32>
      %c0_32 = arith.constant 0 : index
      %c0_33 = arith.constant 0 : index
      %52 = vector.load %arg11[%c0_32, %c0_33] : memref<16x32xf32, #tpu.memory_space<vmem>>, vector<16x32xf32>
      tpu.vector_store %arg11[%c0_32, %c0_33], %51 {strides = array<i32>} : memref<16x32xf32, #tpu.memory_space<vmem>>, vector<16x32xf32>,
    } else {
    }
    %c0 = arith.constant 0 : index
    %c0_1 = arith.constant 0 : index
    %3 = vector.load %arg11[%c0, %c0_1] : memref<16x32xf32, #tpu.memory_space<vmem>>, vector<16x32xf32>
    %c0_2 = arith.constant 0 : index
    %c0_3 = arith.constant 0 : index
    %4 = vector.load %arg3[%c0_2, %c0_3] : memref<32x64xf32, #tpu.memory_space<vmem>>, vector<32x64xf32>
    %cst = arith.constant dense<0.000000e+00> : vector<16x64xf32>
    %5 = tpu.matmul %3, %4, %cst {dimension_numbers = #tpu.dot_dimension_numbers<[1], [0], [0], [1], [0, 0, 1, 1], [], []>} : vector<16x32xf32>, vector<32x64xf32>, vector<16x64xf32> -> vector<16x64xf32>
    %c0_4 = arith.constant 0 : index
    %c0_5 = arith.constant 0 : index
    %6 = vector.load %arg4[%c0_4, %c0_5] : memref<1x64xf32, #tpu.memory_space<vmem>>, vector<1x64xf32>
    %7 = vector.broadcast %6 : vector<1x64xf32> to vector<16x64xf32>
    %8 = arith.addf %5, %7 : vector<16x64xf32>
    %cst_6 = arith.constant 5.000000e-01 : f32
    %9 = vector.broadcast %cst_6 : f32 to vector<16x64xf32>
    %10 = arith.mulf %9, %8 : vector<16x64xf32>
    %cst_7 = arith.constant 0.707106769 : f32
    %11 = vector.broadcast %cst_7 : f32 to vector<16x64xf32>
    %12 = arith.mulf %8, %11 : vector<16x64xf32>
    %13 = math.erf %12 : vector<16x64xf32>
    %cst_8 = arith.constant 1.000000e+00 : f32
    %14 = vector.broadcast %cst_8 : f32 to vector<16x64xf32>
    %15 = arith.addf %14, %13 : vector<16x64xf32>
    %16 = arith.mulf %10, %15 : vector<16x64xf32>
    %c0_9 = arith.constant 0 : index
    %c0_10 = arith.constant 0 : index
    %17 = vector.load %arg10[%c0_9, %c0_10] : memref<16x32xf32, #tpu.memory_space<vmem>>, vector<16x32xf32>
    %c0_11 = arith.constant 0 : index
    %c0_12 = arith.constant 0 : index
    %18 = vector.load %arg5[%c0_11, %c0_12] : memref<64x32xf32, #tpu.memory_space<vmem>>, vector<64x32xf32>
    %cst_13 = arith.constant dense<0.000000e+00> : vector<16x32xf32>
    %19 = tpu.matmul %16, %18, %cst_13 {dimension_numbers = #tpu.dot_dimension_numbers<[1], [0], [0], [1], [0, 0, 1, 1], [], []>} : vector<16x64xf32>, vector<64x32xf32>, vector<16x32xf32> -> vector<16x32xf32>
    %20 = arith.addf %17, %19 : vector<16x32xf32>
    %c0_14 = arith.constant 0 : index
    %c0_15 = arith.constant 0 : index
    %21 = vector.load %arg10[%c0_14, %c0_15] : memref<16x32xf32, #tpu.memory_space<vmem>>, vector<16x32xf32>
    tpu.vector_store %arg10[%c0_14, %c0_15], %20 {strides = array<i32>} : memref<16x32xf32, #tpu.memory_space<vmem>>, vector<16x32xf32>,
    %c0_i32_16 = arith.constant 0 : i32
    %22 = arith.cmpi eq, %arg1, %c0_i32_16 : i32
    %23 = arith.extui %22 : i1 to i32
    %c0_i32_17 = arith.constant 0 : i32
    %24 = arith.cmpi ne, %23, %c0_i32_17 : i32
    scf.if %24 {
      %c0_18 = arith.constant 0 : index
      %c0_19 = arith.constant 0 : index
      %25 = vector.load %arg10[%c0_18, %c0_19] : memref<16x32xf32, #tpu.memory_space<vmem>>, vector<16x32xf32>
      %c0_20 = arith.constant 0 : index
      %c0_21 = arith.constant 0 : index
      %26 = vector.load %arg6[%c0_20, %c0_21] : memref<1x32xf32, #tpu.memory_space<vmem>>, vector<1x32xf32>
      %27 = vector.broadcast %26 : vector<1x32xf32> to vector<16x32xf32>
      %28 = arith.addf %25, %27 : vector<16x32xf32>
      %c0_22 = arith.constant 0 : index
      %c0_23 = arith.constant 0 : index
      %29 = vector.load %arg2[%c0_22, %c0_23] : memref<16x32xf32, #tpu.memory_space<vmem>>, vector<16x32xf32>
      %30 = arith.addf %28, %29 : vector<16x32xf32>
      %c0_24 = arith.constant 0 : index
      %c0_25 = arith.constant 0 : index
      %31 = vector.load %arg9[%c0_24, %c0_25] : memref<16x32xf32, #tpu.memory_space<vmem>>, vector<16x32xf32>
      tpu.vector_store %arg9[%c0_24, %c0_25], %30 {strides = array<i32>} : memref<16x32xf32, #tpu.memory_space<vmem>>, vector<16x32xf32>,
    } else {
    }
    return
  }
  func.func @transform_0(%arg0: i32, %arg1: i32) -> (i32, i32) {
    %c0_i32 = arith.constant 0 : i32
    %c0_i32_0 = arith.constant 0 : i32
    return %arg0, %c0_i32 : i32, i32
  }
  func.func @transform_1(%arg0: i32, %arg1: i32) -> (i32, i32) {
    %c0_i32 = arith.constant 0 : i32
    %c0_i32_0 = arith.constant 0 : i32
    return %c0_i32, %arg1 : i32, i32
  }
  func.func @transform_2(%arg0: i32, %arg1: i32) -> (i32, i32) {
    %c0_i32 = arith.constant 0 : i32
    %c0_i32_0 = arith.constant 0 : i32
    return %c0_i32, %arg1 : i32, i32
  }
  func.func @transform_3(%arg0: i32, %arg1: i32) -> (i32, i32) {
    %c0_i32 = arith.constant 0 : i32
    %c0_i32_0 = arith.constant 0 : i32
    return %arg1, %c0_i32 : i32, i32
  }
  func.func @transform_4(%arg0: i32, %arg1: i32) -> (i32, i32) {
    %c0_i32 = arith.constant 0 : i32
    %c0_i32_0 = arith.constant 0 : i32
    %c0_i32_1 = arith.constant 0 : i32
    return %c0_i32, %c0_i32_0 : i32, i32
  }
  func.func @transform_5(%arg0: i32, %arg1: i32) -> (i32, i32) {
    %c0_i32 = arith.constant 0 : i32
    %c0_i32_0 = arith.constant 0 : i32
    %c0_i32_1 = arith.constant 0 : i32
    return %c0_i32, %c0_i32_0 : i32, i32
  }
  func.func @transform_6(%arg0: i32, %arg1: i32) -> (i32, i32) {
    %c0_i32 = arith.constant 0 : i32
    %c0_i32_0 = arith.constant 0 : i32
    %c0_i32_1 = arith.constant 0 : i32
    return %c0_i32, %c0_i32_0 : i32, i32
  }
  func.func @transform_7(%arg0: i32, %arg1: i32) -> (i32, i32) {
    %c0_i32 = arith.constant 0 : i32
    %c0_i32_0 = arith.constant 0 : i32
    return %arg0, %c0_i32 : i32, i32
  }
}

</mosaic_0001>

<bundles_post_ra>
// kernel: tpu_custom_call.1
= control target key start
LH: loop header
LB: loop body
LE: loop exit
PB: predicated region body
PF: predicated region fallthrough
CT: control target
= control target key end

     0   :  { %vm31_vm0 = vcmask 261120   ;;  %s568_s0 = inlined_call_operand.vmem [shape: f32[16,32], index: 0, kind: input, shape index: {}]   ;;  %s569_s1 = inlined_call_operand.vmem [shape: f32[32,64], index: 1, kind: input, shape index: {}]   ;;  %s570_s2 = inlined_call_operand.vmem [shape: f32[1,64], index: 2, kind: input, shape index: {}]   ;;  %s571_s3 = inlined_call_operand.vmem [shape: f32[64,32], index: 3, kind: input, shape index: {}]   ;;  %s572_s4 = inlined_call_operand.vmem [shape: f32[1,32], index: 4, kind: input, shape index: {}]   ;;  %s573_s5 = inlined_call_operand.vmem [shape: f32[1,32], index: 5, kind: input, shape index: {}]   ;;  %s574_s6 = inlined_call_operand.vmem [shape: f32[1,32], index: 6, kind: input, shape index: {}]   ;;  %s575_s7 = inlined_call_operand.hbm [shape: f32[16,32], index: 7, kind: output, shape index: {}]  }
   0x1   :  { %v481_v0 = vld [vmem:[%s568_s0] sm:$0xff]  ;;  %v486_v1 = vld [vmem:[%s568_s0 + $0x8] sm:$0xff] }
   0x2   :  { %12 = vsyncpa [#allocation5], 0  ;;  %v38_v2 = vsel %vm31_vm0, %v481_v0, 0.0  ;;  %v41_v3 = vsel %vm31_vm0, %v486_v1, 0.0  ;;  %v85_v14 = vld [vmem:[%s569_s1] sm:$0xff]  ;;  %v86_v15 = vld [vmem:[%s569_s1 + $0x8] sm:$0xff] }
   0x3   :  { %39 = vadd.xlane.f32.xlu0 %v38_v2  ;;  %v374_v16 = vpack.c.bf16 %v86_v15, %v85_v14  ;;  %v87_v17 = vld [vmem:[%s569_s1 + $0x10] sm:$0xff]  ;;  %v88_v18 = vld [vmem:[%s569_s1 + $0x18] sm:$0xff]  ;;  %v320_v27 = vld [vmem:[%s573_s5] ss:$0 sm:$0xff]  ;;  %v434_v50 = vmov 0.0   ;;  %vm198_vm1 = vcmask 523264  }
   0x4   :  { %v378_v19 = vpack.c.bf16 %v88_v18, %v87_v17  ;;  %v321_v29 = vld [vmem:[%s574_s6] ss:$0 sm:$0xff]  ;;  %v191_v39 = vld [vmem:[%s571_s3 + $0x8] sm:$0xff]  ;;  %v192_v41 = vld [vmem:[%s571_s3 + $0x10] sm:$0xff]  ;;  %33 = vst.msk [vmem:[#allocation2 + $0x8] sm:$0xff] %vm31_vm0, %v434_v50  ;;  %s435_s30 = smov [#allocation4]  }
   0x5   :  { %375 = vmatprep.subr.bf16.mxu0 %v374_v16  ;;  %v190_v38 = vld [vmem:[%s571_s3] sm:$0xff]  ;;  %v193_v42 = vld [vmem:[%s571_s3 + $0x18] sm:$0xff]  ;;  %v195_v45 = vld [vmem:[%s571_s3 + $0x28] sm:$0xff]  ;;  %32 = vst.msk [vmem:[#allocation2] sm:$0xff] %vm31_vm0, %v434_v50  ;;  %s309_s8 = sshll.u32 %s435_s30, 4  ;;  %s310_s8 = int_to_ptr.vmem [resolvable:$true] %s309_s8 }
   0x6   :  { %377 = vmatpush3.bf16.msra.mxu0 %v374_v16  ;;  %v382_v40 = vpack.c.bf16 %v191_v39, %v190_v38  ;;  %v386_v43 = vpack.c.bf16 %v193_v42, %v192_v41  ;;  %v194_v44 = vld [vmem:[%s571_s3 + $0x20] sm:$0xff]  ;;  %v196_v47 = vld [vmem:[%s571_s3 + $0x30] sm:$0xff]  ;;  %v197_v48 = vld [vmem:[%s571_s3 + $0x38] sm:$0xff]  ;;  %s410_s9 = scalar_lea.vmem %s310_s8, 256  ;;  %p415_p1 = scmp.lt.s32.totalorder %s310_s8, %s310_s8 }
   0x7   :  { %42 = vadd.xlane.f32.xlu0 %v41_v3  ;;  %379 = vmatprep.subr.bf16.mxu0 %v378_v19  ;;  %v390_v46 = vpack.c.bf16 %v195_v45, %v194_v44  ;;  %v394_v49 = vpack.c.bf16 %v197_v48, %v196_v47  ;;  %v322_v51 = vld [vmem:[%s570_s2] ss:$0 sm:$0xff]  ;;  %p411_p0 = scmp.ne.s32.totalorder %s310_s8, %s410_s9  ;;  %p416_p2 = scmp.lt.s32.totalorder %s410_s9, %s410_s9 }
   0x8   :  { %383 = vmatprep.subr.bf16.mxu1 %v382_v40 }
   0x9   :  { %385 = vmatpush3.bf16.msra.mxu1 %v382_v40  ;;  %p417_p3 = por %p416_p2, %p415_p1 }
   0xa   :  { %381 = vmatpush3.bf16.msra.mxu0 %v378_v19  ;;  %387 = vmatprep.subr.bf16.mxu1 %v386_v43 }
   0xb   :  { %p418_p4 = pnand %p417_p3, %p411_p0 }
   0xd   :  { %389 = vmatpush3.bf16.msra.mxu1 %v386_v43 }
   0xe   :  { %391 = vmatprep.subr.bf16.mxu1 %v390_v46 }
  0x11   :  { %393 = vmatpush3.bf16.msra.mxu1 %v390_v46 }
  0x12   :  { %395 = vmatprep.subr.bf16.mxu1 %v394_v49 }
  0x15   :  { %397 = vmatpush3.bf16.msra.mxu1 %v394_v49 }
  0x90   :  { %v40_v4 = vpop.xlane.xlu0 %39 }
  0x91   :  { %v45_v5 = vmul.f32 0.03125, %v40_v4  ;;  %v189_v4 = vld [vmem:[#allocation2 + $0x8] sm:$0xff] }
  0x93   :  { %v47_v6 = vsub.f32 %v481_v0, %v45_v5  ;;  %v188_v5 = vld [vmem:[#allocation2] sm:$0xff] }
  0x94   :  { %v43_v7 = vpop.xlane.xlu0 %42 }
  0x95   :  { %v46_v8 = vmul.f32 0.03125, %v43_v7  ;;  %v49_v9 = vmul.f32 %v47_v6, %v47_v6 }
  0x97   :  { %v48_v10 = vsub.f32 %v486_v1, %v46_v8  ;;  %v51_v11 = vsel %vm31_vm0, %v49_v9, 0.0 }
  0x98   :  { %52 = vadd.xlane.f32.xlu1 %v51_v11 }
  0x99   :  { %v50_v12 = vmul.f32 %v48_v10, %v48_v10 }
  0x9b   :  { %v54_v13 = vsel %vm31_vm0, %v50_v12, 0.0 }
  0x9c   :  { %55 = vadd.xlane.f32.xlu1 %v54_v13 }
 0x125   :  { %v53_v20 = vpop.xlane.xlu1 %52 }
 0x126   :  { %v57_v21 = vmul.f32 0.03125, %v53_v20 }
 0x128   :  { %v59_v22 = vadd.f32 1e-06, %v57_v21 }
 0x129   :  { %v56_v23 = vpop.xlane.xlu1 %55 }
 0x12a   :  { %402 = vrsqrt.f32 %v59_v22  ;;  %v58_v24 = vmul.f32 0.03125, %v56_v23 }
 0x12c   :  { %v60_v25 = vadd.f32 1e-06, %v58_v24 }
 0x12e   :  { %404 = vrsqrt.f32 %v60_v25 }
 0x134   :  { %v403_v26 = vpop.eup %402 }
 0x135   :  { %v63_v28 = vmul.f32 %v403_v26, %v47_v6 }
 0x137   :  { %v71_v30 = vmul.f32 %v320_v27, %v63_v28 }
 0x138   :  { %v405_v31 = vpop.eup %404 }
 0x139   :  { %v79_v32 = vadd.f32 %v321_v29, %v71_v30  ;;  %v64_v33 = vmul.f32 %v405_v31, %v48_v10  ;;  %v327_v10 = vld [vmem:[%s572_s4] ss:$0 sm:$0xff] }
 0x13b   :  { %81 = vst.msk [vmem:[#allocation3] sm:$0xff] %vm31_vm0, %v79_v32  ;;  %v72_v34 = vmul.f32 %v320_v27, %v64_v33 }
 0x13d   :  { %v80_v35 = vadd.f32 %v321_v29, %v72_v34 }
 0x13f   :  { %82 = vst.msk [vmem:[#allocation3 + $0x8] sm:$0xff] %vm31_vm0, %v80_v35 }
 0x142   :  { %v83_v36 = vld [vmem:[#allocation3] sm:$0xff] }
 0x143   :  { %352 = vmatprep.mubr.msk.f32.mxu0 %vm31_vm0, %v83_v36 }
 0x146   :  { %v84_v37 = vld [vmem:[#allocation3 + $0x8] sm:$0xff] }
 0x147   :  { %353 = vmatmul.mubr.msk.f32.vlgmr.msra.gmra.mrb[0].mxu0 %vm31_vm0, %v84_v37 }
 0x21a   :  { %v354_v52 = vpop.f32.mrb[0].mxu0 }
 0x21b   :  { %v175_v53 = vadd.f32 %v354_v52, %v322_v51  ;;  %v169_v54 = vpop.f32.mrb[1].mxu0 }
 0x21c   :  { %v170_v55 = vadd.f32 %v322_v51, %v169_v54 }
 0x21d   :  { %v181_v56 = vmul.f32 0.70710677, %v175_v53  ;;  %v179_v63 = vmul.f32 0.5, %v175_v53 }
 0x21e   :  { %v180_v57 = vmul.f32 0.70710677, %v170_v55  ;;  %v178_v61 = vmul.f32 0.5, %v170_v55 }
 0x21f   :  { %406 = verf.f32 %v181_v56 }
 0x220   :  { %408 = verf.f32 %v180_v57 }
 0x229   :  { %v407_v58 = vpop.eup %406 }
 0x22a   :  { %v409_v59 = vpop.eup %408  ;;  %v185_v60 = vadd.f32 1.0, %v407_v58 }
 0x22b   :  { %v184_v62 = vadd.f32 1.0, %v409_v59 }
 0x22c   :  { %v187_v3 = vmul.f32 %v185_v60, %v179_v63 }
 0x22d   :  { %v186_v2 = vmul.f32 %v184_v62, %v178_v61 }
 0x22f   :  { %371 = vmatprep.mubr.msk.f32.mxu1 %vm198_vm1, %v186_v2 }
 0x230   :  { %372 = vmatmul.mubr.msk.f32.vlgmr.msra.gmra.mrb[0].mxu1 %vm198_vm1, %v187_v3 }
 0x303   :  { %v373_v6 = vpop.f32.mrb[0].mxu1 }
 0x304   :  { %v281_v7 = vadd.f32 %v373_v6, %v189_v4  ;;  %v271_v8 = vpop.f32.mrb[1].mxu1 }
 0x305   :  { %v280_v9 = vadd.f32 %v271_v8, %v188_v5 }
 0x306   :  { %283 = vst.msk [vmem:[#allocation2 + $0x8] sm:$0xff] %vm31_vm0, %v281_v7 }
 0x307   :  { %282 = vst.msk [vmem:[#allocation2] sm:$0xff] %vm31_vm0, %v280_v9 }
 0x30d   :  { %v288_v11 = vld [vmem:[#allocation2 + $0x8] sm:$0xff] }
 0x30e   :  { %v287_v12 = vld [vmem:[#allocation2] sm:$0xff]  ;;  %v297_v13 = vadd.f32 %v327_v10, %v288_v11 }
 0x30f   :  { %v296_v14 = vadd.f32 %v327_v10, %v287_v12 }
 0x310   :  { %v301_v15 = vadd.f32 %v297_v13, %v486_v1 }
 0x311   :  { %v300_v16 = vadd.f32 %v296_v14, %v481_v0 }
 0x312   :  { %303 = vst.msk [vmem:[#allocation4 + $0x8] sm:$0xff] %vm31_vm0, %v301_v15 }
 0x313   :  { %302 = vst.msk [vmem:[#allocation4] sm:$0xff] %vm31_vm0, %v300_v16 }
 0x314   :  { %421 = shalt.err (!%p418_p4)
}
 0x315   :  { %s422_s11 = scalar_lea.hbm %s575_s7, 256 }
 0x316   :  { %p423_p5 = scmp.ne.s32.totalorder %s575_s7, %s422_s11  ;;  %p426_p6 = scmp.lt.u32.totalorder %s422_s11, %s575_s7 }
 0x318   :  { %p428_p7 = pnand %p426_p6, %p423_p5 }
 0x31a   :  { %431 = shalt.err (!%p428_p7)
}
 0x31b   :  { %s436_s5 = smov 128   ;;  %s437_s15 = smov 8  }
 0x31c   :  { %315 = dma.vmem_to_hbm [thread:$0]  %s310_s8, 256, %s575_s7, [#allocation5], %s436_s5, %s436_s5, %s437_s15  }
 0x31d   :  { %432 = dma.done.wait [#allocation5], 256  }
 0x31e   :  { %433 = vsyncadd [#allocation5], 4294967040 }
 0x31f   :  { %319 = vsyncpa [#allocation5], 1 }

</bundles_post_ra>
